<compile_context>
chip_gen: v5e
topology: v5e:2x2
jax: 0.10.0
libtpu: 0.0.40
codegen_flags: <defaults>
</compile_context>

<pallas_src>
import jax
import jax.numpy as jnp
from jax.experimental import pallas as pl
from jax.experimental.pallas import tpu as pltpu


def _round_up(v, m):
    return (v + m - 1) // m * m


def _mlp_fwd_kernel(x_ref, w1_ref, b1_ref, w2_ref, b2_ref, logp_ref, out_ref):
    # Cast x to bf16 in-kernel (free VPU work; avoids an extra HBM pass in the
    # wrapper).
    x = x_ref[...].astype(jnp.bfloat16)                          # (TM, nfeat)

    # fc1: bf16 operands on the MXU, f32 accumulation; bias add in f32.
    out = jnp.dot(x, w1_ref[...], preferred_element_type=jnp.float32) + b1_ref[...]
    out_ref[...] = out.astype(out_ref.dtype)                     # (TM, nhid) f32

    # relu (f32 on the VPU)
    h = jnp.maximum(out, 0.0)
    # TODO(synk): dropout is identity here (module eval mode, training=False).

    # fc2: cast activations back to bf16 for the MXU, accumulate in f32.
    logits = jnp.dot(h.astype(jnp.bfloat16), w2_ref[...],
                     preferred_element_type=jnp.float32) + b2_ref[...]   # (TM, nclass)

    # log_softmax over the true class width (no padded lanes to mask).
    m = jnp.max(logits, axis=1, keepdims=True)
    shifted = logits - m
    lse = jnp.log(jnp.sum(jnp.exp(shifted), axis=1, keepdims=True))
    logp_ref[...] = (shifted - lse).astype(logp_ref.dtype)


def _vmem_limit_bytes():
    """Per-generation VMEM budget (75% of physical, clamped), with a fallback."""
    try:
        cap = pltpu.get_tpu_info().vmem_capacity_bytes
    except Exception:
        cap = 64 * 1024 * 1024
    return max(32 * 1024 * 1024, min(int(0.75 * cap), 112 * 1024 * 1024))


def mlp_forward(x, w1, b1, w2, b2, *, tm=1024):
    """x: (N, nfeat) f32; w1: (nfeat, nhid); b1: (nhid,); w2: (nhid, nclass); b2: (nclass,).

    Returns (log_softmax(fc2(relu(fc1(x)))), fc1(x)) exactly like MLP.forward
    (dropout is identity in eval mode).  Matmuls use bf16 operands with f32
    accumulation.
    """
    N, nfeat = x.shape
    nhid = w1.shape[1]
    nclass = w2.shape[1]

    vmem_limit = _vmem_limit_bytes()

    # --- choose the row tile -------------------------------------------------
    # Per-row streamed bytes (double-buffered): x f32 in, out/logp f32 out.
    per_row = 2 * 4 * (nfeat + nhid + nclass)
    # Resident weights/biases (assume worst-case double-buffered for the budget).
    weight_bytes = (nfeat * nhid + nhid * nclass) * 2 + (nhid + nclass) * 4
    budget = int(0.6 * vmem_limit) - 2 * weight_bytes
    tm_vmem = max(16, (budget // max(per_row, 1)) // 16 * 16)
    # Keep the row grid at >= 2 steps so both v7x TensorCores get work.
    tm_two_steps = max(16, _round_up(pl.cdiv(N, 2), 16))
    tm = max(16, min(tm, tm_vmem, tm_two_steps))

    n_p = _round_up(N, tm)
    grid = (n_p // tm,)

    # Only pad rows when needed; never pad/cast x in a separate pass otherwise.
    if n_p != N:
        x_in = jnp.zeros((n_p, nfeat), x.dtype).at[:N].set(x)
    else:
        x_in = x

    # Weights to bf16 for the MXU; biases as (1, width) f32 rows (tiny arrays).
    w1_b = w1.astype(jnp.bfloat16)
    w2_b = w2.astype(jnp.bfloat16)
    b1_r = b1.astype(jnp.float32).reshape(1, nhid)
    b2_r = b2.astype(jnp.float32).reshape(1, nclass)

    itemsize_x = jnp.dtype(x.dtype).itemsize
    cost = pl.CostEstimate(
        flops=2 * N * (nfeat * nhid + nhid * nclass),
        transcendentals=N * nclass,
        bytes_accessed=(n_p * nfeat * itemsize_x            # x read
                        + n_p * (nhid + nclass) * 4         # out + logp write
                        + (nfeat * nhid + nhid * nclass) * 2  # weights
                        + (nhid + nclass) * 4),              # biases
    )

    def build(weight_pipeline):
        wkw = {} if weight_pipeline is None else {"pipeline_mode": weight_pipeline}
        in_specs = [
            pl.BlockSpec((tm, nfeat), lambda i: (i, 0)),          # x streamed per row tile
            pl.BlockSpec((nfeat, nhid), lambda i: (0, 0), **wkw),  # W1 resident
            pl.BlockSpec((1, nhid), lambda i: (0, 0), **wkw),      # b1 resident
            pl.BlockSpec((nhid, nclass), lambda i: (0, 0), **wkw),  # W2 resident
            pl.BlockSpec((1, nclass), lambda i: (0, 0), **wkw),     # b2 resident
        ]
        return pl.pallas_call(
            _mlp_fwd_kernel,
            out_shape=(
                jax.ShapeDtypeStruct((n_p, nclass), jnp.float32),  # log_softmax(fc2(...))
                jax.ShapeDtypeStruct((n_p, nhid), jnp.float32),    # out = fc1(x)
            ),
            grid=grid,
            in_specs=in_specs,
            out_specs=(
                pl.BlockSpec((tm, nclass), lambda i: (i, 0)),
                pl.BlockSpec((tm, nhid), lambda i: (i, 0)),
            ),
            compiler_params=pltpu.CompilerParams(
                dimension_semantics=("parallel",),   # shard row tiles over TCs (v7x)
                vmem_limit_bytes=vmem_limit,
            ),
            cost_estimate=cost,
        )

    args = (x_in, w1_b, b1_r, w2_b, b2_r)
    try:
        # Single-buffer the resident weights (constant index_map): halves their
        # VMEM footprint.
        logp_p, out_p = build(pl.Buffered(1))(*args)
        jax.block_until_ready((logp_p, out_p))
    except Exception:
        # Fallback if this JAX/Mosaic build rejects pipeline_mode=Buffered(1).
        logp_p, out_p = build(None)(*args)

    # Strip row padding only when it was added (no lane padding to strip).
    if n_p != N:
        return logp_p[:N], out_p[:N]
    return logp_p, out_p


def init_linear(key, in_features, out_features):
    """PyTorch nn.Linear default init: U(-1/sqrt(in), 1/sqrt(in)) for W and b."""
    kw, kb = jax.random.split(key)
    bound = 1.0 / jnp.sqrt(jnp.float32(in_features))
    # Stored PyTorch-style (out, in) then transposed for the kernel.
    w = jax.random.uniform(kw, (out_features, in_features), jnp.float32, -bound, bound)
    b = jax.random.uniform(kb, (out_features,), jnp.float32, -bound, bound)
    return w.T, b   # (in, out), (out,)


if __name__ == "__main__":
    # Small shapes consistent with the module: N nodes, nfeat -> nhid -> nclass.
    # nclass=7 (typical GCN) exercises the unpadded, non-128 lane width; the
    # auto tile selection gives tm=16 -> a 2-step grid with row padding.
    N, nfeat, nhid, nclass = 24, 16, 32, 7

    key = jax.random.PRNGKey(0)
    kx, k1, k2 = jax.random.split(key, 3)

    x = jax.random.normal(kx, (N, nfeat), jnp.float32)
    w1, b1 = init_linear(k1, nfeat, nhid)     # fc1
    w2, b2 = init_linear(k2, nhid, nclass)    # fc2

    logp, out = mlp_forward(x, w1, b1, w2, b2)
    jax.block_until_ready((logp, out))

    assert logp.shape == (N, nclass) and out.shape == (N, nhid)

    # Reference with the same numerics (bf16 matmul operands, f32 accumulation).
    xb = x.astype(jnp.bfloat16)
    w1b = w1.astype(jnp.bfloat16)
    w2b = w2.astype(jnp.bfloat16)
    out_ref = jnp.dot(xb, w1b, preferred_element_type=jnp.float32) + b1
    h_ref = jnp.maximum(out_ref, 0.0)
    logits_ref = jnp.dot(h_ref.astype(jnp.bfloat16), w2b,
                         preferred_element_type=jnp.float32) + b2
    logp_ref = jax.nn.log_softmax(logits_ref, axis=1)

    assert jnp.allclose(out, out_ref, atol=2e-3, rtol=2e-3)
    assert jnp.allclose(logp, logp_ref, atol=2e-3, rtol=2e-3)

    print("KERNEL_OK")
</pallas_src>

<mosaic_0001>
module attributes {stable_mosaic.version = 11 : i64} {
  func.func @_mlp_fwd_kernel(%arg0: i32, %arg1: memref<16x16xf32, #tpu.memory_space<vmem>>, %arg2: memref<16x32xbf16, #tpu.memory_space<vmem>>, %arg3: memref<1x32xf32, #tpu.memory_space<vmem>>, %arg4: memref<32x7xbf16, #tpu.memory_space<vmem>>, %arg5: memref<1x7xf32, #tpu.memory_space<vmem>>, %arg6: memref<16x7xf32, #tpu.memory_space<vmem>>, %arg7: memref<16x32xf32, #tpu.memory_space<vmem>>) attributes {dimension_semantics = [#tpu.dimension_semantics<parallel>], iteration_bounds = array<i64: 2>, scalar_prefetch = 0 : i64, scratch_operands = 0 : i64, tpu.core_type = #tpu.core_type<tc>, window_params = [{transform_indices = @transform_0, window_bounds = array<i64: 16, 16>}, {pipeline_mode = #tpu.pipeline_mode<synchronous>, transform_indices = @transform_1, window_bounds = array<i64: 16, 32>}, {pipeline_mode = #tpu.pipeline_mode<synchronous>, transform_indices = @transform_2, window_bounds = array<i64: 1, 32>}, {pipeline_mode = #tpu.pipeline_mode<synchronous>, transform_indices = @transform_3, window_bounds = array<i64: 32, 7>}, {pipeline_mode = #tpu.pipeline_mode<synchronous>, transform_indices = @transform_4, window_bounds = array<i64: 1, 7>}, {transform_indices = @transform_5, window_bounds = array<i64: 16, 7>}, {transform_indices = @transform_6, window_bounds = array<i64: 16, 32>}]} {
    %c0 = arith.constant 0 : index
    %c0_0 = arith.constant 0 : index
    %0 = vector.load %arg1[%c0, %c0_0] : memref<16x16xf32, #tpu.memory_space<vmem>>, vector<16x16xf32>
    %1 = arith.truncf %0 : vector<16x16xf32> to vector<16x16xbf16>
    %c0_1 = arith.constant 0 : index
    %c0_2 = arith.constant 0 : index
    %2 = vector.load %arg2[%c0_1, %c0_2] : memref<16x32xbf16, #tpu.memory_space<vmem>>, vector<16x32xbf16>
    %cst = arith.constant dense<0.000000e+00> : vector<16x32xf32>
    %3 = tpu.matmul %1, %2, %cst {dimension_numbers = #tpu.dot_dimension_numbers<[1], [0], [0], [1], [0, 0, 1, 1], [], []>} : vector<16x16xbf16>, vector<16x32xbf16>, vector<16x32xf32> -> vector<16x32xf32>
    %c0_3 = arith.constant 0 : index
    %c0_4 = arith.constant 0 : index
    %4 = vector.load %arg3[%c0_3, %c0_4] : memref<1x32xf32, #tpu.memory_space<vmem>>, vector<1x32xf32>
    %5 = vector.broadcast %4 : vector<1x32xf32> to vector<16x32xf32>
    %6 = arith.addf %3, %5 : vector<16x32xf32>
    %c0_5 = arith.constant 0 : index
    %c0_6 = arith.constant 0 : index
    %7 = vector.load %arg7[%c0_5, %c0_6] : memref<16x32xf32, #tpu.memory_space<vmem>>, vector<16x32xf32>
    tpu.vector_store %arg7[%c0_5, %c0_6], %6 {strides = array<i32>} : memref<16x32xf32, #tpu.memory_space<vmem>>, vector<16x32xf32>,
    %cst_7 = arith.constant 0.000000e+00 : f32
    %8 = vector.broadcast %cst_7 : f32 to vector<16x32xf32>
    %9 = arith.maximumf %6, %8 : vector<16x32xf32>
    %10 = arith.truncf %9 : vector<16x32xf32> to vector<16x32xbf16>
    %c0_8 = arith.constant 0 : index
    %c0_9 = arith.constant 0 : index
    %11 = vector.load %arg4[%c0_8, %c0_9] : memref<32x7xbf16, #tpu.memory_space<vmem>>, vector<32x7xbf16>
    %cst_10 = arith.constant dense<0.000000e+00> : vector<16x7xf32>
    %12 = tpu.matmul %10, %11, %cst_10 {dimension_numbers = #tpu.dot_dimension_numbers<[1], [0], [0], [1], [0, 0, 1, 1], [], []>} : vector<16x32xbf16>, vector<32x7xbf16>, vector<16x7xf32> -> vector<16x7xf32>
    %c0_11 = arith.constant 0 : index
    %c0_12 = arith.constant 0 : index
    %13 = vector.load %arg5[%c0_11, %c0_12] : memref<1x7xf32, #tpu.memory_space<vmem>>, vector<1x7xf32>
    %14 = vector.broadcast %13 : vector<1x7xf32> to vector<16x7xf32>
    %15 = arith.addf %12, %14 : vector<16x7xf32>
    %cst_13 = arith.constant dense<0xFF800000> : vector<16xf32>
    %16 = vector.multi_reduction <maximumf>, %15, %cst_13 [1] : vector<16x7xf32> to vector<16xf32>
    %17 = vector.shape_cast %16 : vector<16xf32> to vector<16x1xf32>
    %18 = vector.broadcast %17 : vector<16x1xf32> to vector<16x7xf32>
    %19 = arith.subf %15, %18 : vector<16x7xf32>
    %20 = math.exp %19 : vector<16x7xf32>
    %cst_14 = arith.constant dense<0.000000e+00> : vector<16xf32>
    %21 = vector.multi_reduction <add>, %20, %cst_14 [1] : vector<16x7xf32> to vector<16xf32>
    %22 = vector.shape_cast %21 : vector<16xf32> to vector<16x1xf32>
    %23 = math.log %22 : vector<16x1xf32>
    %24 = vector.broadcast %23 : vector<16x1xf32> to vector<16x7xf32>
    %25 = arith.subf %19, %24 : vector<16x7xf32>
    %c0_15 = arith.constant 0 : index
    %c0_16 = arith.constant 0 : index
    %26 = vector.load %arg6[%c0_15, %c0_16] : memref<16x7xf32, #tpu.memory_space<vmem>>, vector<16x7xf32>
    tpu.vector_store %arg6[%c0_15, %c0_16], %25 {strides = array<i32>} : memref<16x7xf32, #tpu.memory_space<vmem>>, vector<16x7xf32>,
    return
  }
  func.func @transform_0(%arg0: i32) -> (i32, i32) {
    %c0_i32 = arith.constant 0 : i32
    %c0_i32_0 = arith.constant 0 : i32
    return %arg0, %c0_i32 : i32, i32
  }
  func.func @transform_1(%arg0: i32) -> (i32, i32) {
    %c0_i32 = arith.constant 0 : i32
    %c0_i32_0 = arith.constant 0 : i32
    %c0_i32_1 = arith.constant 0 : i32
    return %c0_i32, %c0_i32_0 : i32, i32
  }
  func.func @transform_2(%arg0: i32) -> (i32, i32) {
    %c0_i32 = arith.constant 0 : i32
    %c0_i32_0 = arith.constant 0 : i32
    %c0_i32_1 = arith.constant 0 : i32
    return %c0_i32, %c0_i32_0 : i32, i32
  }
  func.func @transform_3(%arg0: i32) -> (i32, i32) {
    %c0_i32 = arith.constant 0 : i32
    %c0_i32_0 = arith.constant 0 : i32
    %c0_i32_1 = arith.constant 0 : i32
    return %c0_i32, %c0_i32_0 : i32, i32
  }
  func.func @transform_4(%arg0: i32) -> (i32, i32) {
    %c0_i32 = arith.constant 0 : i32
    %c0_i32_0 = arith.constant 0 : i32
    %c0_i32_1 = arith.constant 0 : i32
    return %c0_i32, %c0_i32_0 : i32, i32
  }
  func.func @transform_5(%arg0: i32) -> (i32, i32) {
    %c0_i32 = arith.constant 0 : i32
    %c0_i32_0 = arith.constant 0 : i32
    return %arg0, %c0_i32 : i32, i32
  }
  func.func @transform_6(%arg0: i32) -> (i32, i32) {
    %c0_i32 = arith.constant 0 : i32
    %c0_i32_0 = arith.constant 0 : i32
    return %arg0, %c0_i32 : i32, i32
  }
}

module attributes {stable_mosaic.version = 11 : i64} {
  func.func @_mlp_fwd_kernel(%arg0: i32, %arg1: memref<16x16xf32, #tpu.memory_space<vmem>>, %arg2: memref<16x32xbf16, #tpu.memory_space<vmem>>, %arg3: memref<1x32xf32, #tpu.memory_space<vmem>>, %arg4: memref<32x7xbf16, #tpu.memory_space<vmem>>, %arg5: memref<1x7xf32, #tpu.memory_space<vmem>>, %arg6: memref<16x7xf32, #tpu.memory_space<vmem>>, %arg7: memref<16x32xf32, #tpu.memory_space<vmem>>) attributes {dimension_semantics = [#tpu.dimension_semantics<parallel>], iteration_bounds = array<i64: 2>, scalar_prefetch = 0 : i64, scratch_operands = 0 : i64, tpu.core_type = #tpu.core_type<tc>, window_params = [{transform_indices = @transform_0, window_bounds = array<i64: 16, 16>}, {pipeline_mode = #tpu.pipeline_mode<synchronous>, transform_indices = @transform_1, window_bounds = array<i64: 16, 32>}, {pipeline_mode = #tpu.pipeline_mode<synchronous>, transform_indices = @transform_2, window_bounds = array<i64: 1, 32>}, {pipeline_mode = #tpu.pipeline_mode<synchronous>, transform_indices = @transform_3, window_bounds = array<i64: 32, 7>}, {pipeline_mode = #tpu.pipeline_mode<synchronous>, transform_indices = @transform_4, window_bounds = array<i64: 1, 7>}, {transform_indices = @transform_5, window_bounds = array<i64: 16, 7>}, {transform_indices = @transform_6, window_bounds = array<i64: 16, 32>}]} {
    %c0 = arith.constant 0 : index
    %c0_0 = arith.constant 0 : index
    %0 = vector.load %arg1[%c0, %c0_0] : memref<16x16xf32, #tpu.memory_space<vmem>>, vector<16x16xf32>
    %1 = arith.truncf %0 : vector<16x16xf32> to vector<16x16xbf16>
    %c0_1 = arith.constant 0 : index
    %c0_2 = arith.constant 0 : index
    %2 = vector.load %arg2[%c0_1, %c0_2] : memref<16x32xbf16, #tpu.memory_space<vmem>>, vector<16x32xbf16>
    %cst = arith.constant dense<0.000000e+00> : vector<16x32xf32>
    %3 = tpu.matmul %1, %2, %cst {dimension_numbers = #tpu.dot_dimension_numbers<[1], [0], [0], [1], [0, 0, 1, 1], [], []>} : vector<16x16xbf16>, vector<16x32xbf16>, vector<16x32xf32> -> vector<16x32xf32>
    %c0_3 = arith.constant 0 : index
    %c0_4 = arith.constant 0 : index
    %4 = vector.load %arg3[%c0_3, %c0_4] : memref<1x32xf32, #tpu.memory_space<vmem>>, vector<1x32xf32>
    %5 = vector.broadcast %4 : vector<1x32xf32> to vector<16x32xf32>
    %6 = arith.addf %3, %5 : vector<16x32xf32>
    %c0_5 = arith.constant 0 : index
    %c0_6 = arith.constant 0 : index
    %7 = vector.load %arg7[%c0_5, %c0_6] : memref<16x32xf32, #tpu.memory_space<vmem>>, vector<16x32xf32>
    tpu.vector_store %arg7[%c0_5, %c0_6], %6 {strides = array<i32>} : memref<16x32xf32, #tpu.memory_space<vmem>>, vector<16x32xf32>,
    %cst_7 = arith.constant 0.000000e+00 : f32
    %8 = vector.broadcast %cst_7 : f32 to vector<16x32xf32>
    %9 = arith.maximumf %6, %8 : vector<16x32xf32>
    %10 = arith.truncf %9 : vector<16x32xf32> to vector<16x32xbf16>
    %c0_8 = arith.constant 0 : index
    %c0_9 = arith.constant 0 : index
    %11 = vector.load %arg4[%c0_8, %c0_9] : memref<32x7xbf16, #tpu.memory_space<vmem>>, vector<32x7xbf16>
    %cst_10 = arith.constant dense<0.000000e+00> : vector<16x7xf32>
    %12 = tpu.matmul %10, %11, %cst_10 {dimension_numbers = #tpu.dot_dimension_numbers<[1], [0], [0], [1], [0, 0, 1, 1], [], []>} : vector<16x32xbf16>, vector<32x7xbf16>, vector<16x7xf32> -> vector<16x7xf32>
    %c0_11 = arith.constant 0 : index
    %c0_12 = arith.constant 0 : index
    %13 = vector.load %arg5[%c0_11, %c0_12] : memref<1x7xf32, #tpu.memory_space<vmem>>, vector<1x7xf32>
    %14 = vector.broadcast %13 : vector<1x7xf32> to vector<16x7xf32>
    %15 = arith.addf %12, %14 : vector<16x7xf32>
    %cst_13 = arith.constant dense<0xFF800000> : vector<16xf32>
    %16 = vector.multi_reduction <maximumf>, %15, %cst_13 [1] : vector<16x7xf32> to vector<16xf32>
    %17 = vector.shape_cast %16 : vector<16xf32> to vector<16x1xf32>
    %18 = vector.broadcast %17 : vector<16x1xf32> to vector<16x7xf32>
    %19 = arith.subf %15, %18 : vector<16x7xf32>
    %20 = math.exp %19 : vector<16x7xf32>
    %cst_14 = arith.constant dense<0.000000e+00> : vector<16xf32>
    %21 = vector.multi_reduction <add>, %20, %cst_14 [1] : vector<16x7xf32> to vector<16xf32>
    %22 = vector.shape_cast %21 : vector<16xf32> to vector<16x1xf32>
    %23 = math.log %22 : vector<16x1xf32>
    %24 = vector.broadcast %23 : vector<16x1xf32> to vector<16x7xf32>
    %25 = arith.subf %19, %24 : vector<16x7xf32>
    %c0_15 = arith.constant 0 : index
    %c0_16 = arith.constant 0 : index
    %26 = vector.load %arg6[%c0_15, %c0_16] : memref<16x7xf32, #tpu.memory_space<vmem>>, vector<16x7xf32>
    tpu.vector_store %arg6[%c0_15, %c0_16], %25 {strides = array<i32>} : memref<16x7xf32, #tpu.memory_space<vmem>>, vector<16x7xf32>,
    return
  }
  func.func @transform_0(%arg0: i32) -> (i32, i32) {
    %c0_i32 = arith.constant 0 : i32
    %c0_i32_0 = arith.constant 0 : i32
    return %arg0, %c0_i32 : i32, i32
  }
  func.func @transform_1(%arg0: i32) -> (i32, i32) {
    %c0_i32 = arith.constant 0 : i32
    %c0_i32_0 = arith.constant 0 : i32
    %c0_i32_1 = arith.constant 0 : i32
    return %c0_i32, %c0_i32_0 : i32, i32
  }
  func.func @transform_2(%arg0: i32) -> (i32, i32) {
    %c0_i32 = arith.constant 0 : i32
    %c0_i32_0 = arith.constant 0 : i32
    %c0_i32_1 = arith.constant 0 : i32
    return %c0_i32, %c0_i32_0 : i32, i32
  }
  func.func @transform_3(%arg0: i32) -> (i32, i32) {
    %c0_i32 = arith.constant 0 : i32
    %c0_i32_0 = arith.constant 0 : i32
    %c0_i32_1 = arith.constant 0 : i32
    return %c0_i32, %c0_i32_0 : i32, i32
  }
  func.func @transform_4(%arg0: i32) -> (i32, i32) {
    %c0_i32 = arith.constant 0 : i32
    %c0_i32_0 = arith.constant 0 : i32
    %c0_i32_1 = arith.constant 0 : i32
    return %c0_i32, %c0_i32_0 : i32, i32
  }
  func.func @transform_5(%arg0: i32) -> (i32, i32) {
    %c0_i32 = arith.constant 0 : i32
    %c0_i32_0 = arith.constant 0 : i32
    return %arg0, %c0_i32 : i32, i32
  }
  func.func @transform_6(%arg0: i32) -> (i32, i32) {
    %c0_i32 = arith.constant 0 : i32
    %c0_i32_0 = arith.constant 0 : i32
    return %arg0, %c0_i32 : i32, i32
  }
}

</mosaic_0001>

<bundles_post_ra>
// kernel: tpu_custom_call.1
= control target key start
LH: loop header
LB: loop body
LE: loop exit
PB: predicated region body
PF: predicated region fallthrough
CT: control target
= control target key end

     0   :  { %12 = vsyncpa [#allocation3], 0  ;;  %s791_s0 = inlined_call_operand.vmem [shape: f32[32,16], index: 0, kind: input, shape index: {}]   ;;  %s792_s1 = inlined_call_operand.vmem [shape: bf16[16,32], index: 1, kind: input, shape index: {}]   ;;  %s793_s2 = inlined_call_operand.vmem [shape: f32[1,32], index: 2, kind: input, shape index: {}]   ;;  %s794_s3 = inlined_call_operand.vmem [shape: bf16[32,7], index: 3, kind: input, shape index: {}]   ;;  %s795_s4 = inlined_call_operand.vmem [shape: f32[1,7], index: 4, kind: input, shape index: {}]   ;;  %s796_s5 = inlined_call_operand.vmem [shape: f32[32,7], index: 5, kind: output, shape index: {0}]   ;;  %s797_s6 = inlined_call_operand.hbm [shape: f32[32,32], index: 6, kind: output, shape index: {1}]  }
   0x1   :  { %14 = vsyncpa [#allocation3 + $0x1], 0  ;;  %s667_s21 = smov 0   ;;  %s669_s22 = smov 0  }
   0x2   :  { %s671_s23 = smov 0   ;;  %s673_s24 = smov 0  }
   0x3 LB: > { %s688_s25 = sadd.s32 4294967295, %s628_s24   ;;  %s483_s26 = sadd.s32 4294967294, %s628_s24   ;;  %s628_s24 = sphi %s673_s24, %s803_s24   ;;  %s624_s23 = sphi %s671_s23, %s802_s23   ;;  %s620_s22 = sphi %s669_s22, %s801_s22   ;;  %s616_s21 = sphi %s667_s21, %s800_s21  }
   0x4   : > { %s692_s27 = sadd.s32 1, %s628_s24   ;;  %s163_s28 = sadd.s32 1, %s624_s23 }
   0x5   : > { %s160_s29 = ssub.s32 %s628_s24, %s692_s27  ;;  %p173_p0 = scmp.ne.s32.totalorder %s624_s23, %s620_s22 }
   0x6   : > { %p161_p1 = scmp.eq.s32.totalorder %s160_s29, 0  ;;  %p174_p2 = scmp.eq.s32.totalorder %s688_s25, 1 }
   0x7   : > { %p179_p3 = scmp.ne.s32.totalorder %s620_s22, %s616_s21  ;;  %p180_p4 = scmp.eq.s32.totalorder %s483_s26, 1 }
   0x8   : > { %s703_s30 = scalar_select %p161_p1, %s624_s23, %s163_s28  }
   0x9   : > { %p705_p5 = por %p174_p2, %p173_p0  ;;  %p709_p6 = por %p180_p4, %p179_p3 }
   0xa   : > { %p486_p7 = scmp.ge.s32.totalorder %s628_s24, 1  ;;  %p219_p8 = scmp.lt.s32.totalorder %s628_s24, 3 }
   0xc   : > { %p220_p9 = pnand %p486_p7, %p219_p8 }
   0xd   : > { %s488_s11 = sshll.u32 (!%p220_p9), %s688_s25, 1  ;;  %s251_s20 = sand.u32 (!%p220_p9), 1, %s620_s22  }
   0xe   : > { %223 = sbr.rel (%p220_p9) target bundleno = 558 (0x22e), region = 40  ;;  %p255_p10 = scmp.lt.s32.totalorder (!%p220_p9), %s488_s11, 3 }
   0xf   : > { %s487_s29 = sshll.u32 (!%p220_p9), %s251_s20, 4  ;;  %s377_s26 = scalar_lea.sflag (!%p220_p9), [#allocation3], %s251_s20 }
  0x10   : > { %s739_s9 = scalar_lea.vmem (!%p220_p9), [#allocation2], %s487_s29  ;;  %s586_s10 = scalar_lea.hbm (!%p220_p9), %s797_s6, 32 }
  0x11   : > { %s393_s14 = sshll.u32 (!%p220_p9), %s739_s9, 4  ;;  %s394_s14 = int_to_ptr.vmem [resolvable:$true] %s393_s14 }
  0x13   : > { %v511_v0 = vld [vmem:[%s792_s1] sm:$0xff]  ;;  %s805_s11 = smov (!%p255_p10, %s488_s11), 3  ;;  %vm283_vm0 = vcmask 130048   ;;  %v513_v4 = vld [vmem:[%s794_s3 + $0x8] sm:$0xff]  ;;  %vm301_vm1 = vcmask 261120   ;;  %vm344_vm2 = vcmask 56320  }
  0x14   : > { %294 = vmatpush.bf16.msra.mxu0 %v511_v0  ;;  %s489_s12 = sshll.u32 %s805_s11, 3  ;;  %336 = vmatpush.bf16.msra.mxu1 %v513_v4  ;;  %v512_v5 = vld [vmem:[%s794_s3] sm:$0xff] }
  0x15   : > { %s258_s15 = scalar_lea.vmem %s791_s0, %s489_s12  ;;  %v556_v6 = vld [vmem:[%s793_s2] ss:$0 sm:$0xff] }
  0x16   : > { %v268_v1 = vld [vmem:[%s258_s15] sm:$0xff]  ;;  %v269_v2 = vld [vmem:[%s258_s15 + $0x8] sm:$0xff]  ;;  %s514_s15 = sshll.u32 %s688_s25, 4 }
  0x17   : > { %v270_v3 = vpack.c.bf16 %v269_v2, %v268_v1  ;;  %v557_v14 = vld [vmem:[%s795_s4] ss:$0 sm:$0xff]  ;;  %s392_s18 = scalar_lea.hbm %s797_s6, %s514_s15 }
  0x18   : > { %337 = vmatpush.bf16.msra.mxu1 %v512_v5  ;;  %s395_s19 = sshll.u32 %s392_s18, 4  ;;  %s396_s19 = int_to_ptr.hbm [resolvable:$true] %s395_s19 }
  0x19   : > { %496 = vmatmul.msk.bf16.vlgmr.msra.gmra.mxu0 %vm283_vm0, %v270_v3  ;;  %s580_s28 = sshra.s32 %s396_s19, 4  ;;  %s581_s28 = int_to_ptr.hbm [resolvable:$true] %s580_s28 }
  0x1a   : > { %s582_s29 = scalar_lea.hbm %s581_s28, 16  ;;  %p587_p0 = scmp.lt.s32.totalorder %s581_s28, %s797_s6 }
  0x1b   : > { %p583_p11 = scmp.ne.s32.totalorder %s581_s28, %s582_s29  ;;  %p588_p1 = scmp.lt.s32.totalorder %s586_s10, %s582_s29 }
  0x1d   : > { %p584_p12 = pnand %p583_p11, %p705_p5  ;;  %p589_p2 = por %p588_p1, %p587_p0 }
  0x1f   : > { %p585_p13 = pneg %p584_p12 }
  0x21   : > { %p590_p3 = pnand %p589_p2, %p585_p13 }
  0x96   : > { %v296_v7 = vpop.f32.mrf.mxu0 }
  0x97   : > { %v297_v8 = vadd.f32 %v556_v6, %v296_v7 }
  0x99   : > { %302 = vst.msk [vmem:[%s739_s9] sm:$0xff] %vm301_vm1, %v297_v8  ;;  %v304_v11 = vmax.f32 %v297_v8, 0.0 }
  0x9e   : > { %v298_v9 = vpop.f32.mrf.mxu0 }
  0x9f   : > { %v299_v10 = vadd.f32 %v556_v6, %v298_v9 }
  0xa1   : > { %v305_v12 = vmax.f32 %v299_v10, 0.0  ;;  %303 = vst.msk [vmem:[%s739_s9 + $0x8] sm:$0xff] %vm301_vm1, %v299_v10 }
  0xa3   : > { %v306_v13 = vpack.c.bf16 %v305_v12, %v304_v11 }
  0xa5   : > { %505 = vmatmul.msk.bf16.vlgmr.msra.gmra.mxu1 %vm301_vm1, %v306_v13 }
 0x122   : > { %v339_v15 = vpop.f32.mrf.mxu1 }
 0x123   : > { %v340_v16 = vadd.f32 %v557_v14, %v339_v15 }
 0x125   : > { %v345_v17 = vsel %vm344_vm2, %v340_v16, -inf }
 0x126   : > { %346 = vmax.xlane.f32.xlu0 %v345_v17 }
 0x12a   : > { %v341_v18 = vpop.f32.mrf.mxu1 }
 0x12b   : > { %v342_v19 = vadd.f32 %v557_v14, %v341_v18 }
 0x12d   : > { %v348_v20 = vsel %vm344_vm2, %v342_v19, -inf }
 0x12e   : > { %349 = vmax.xlane.f32.xlu0 %v348_v20 }
 0x199   : > { %v347_v21 = vpop.xlane.xlu0 %346 }
 0x19a   : > { %v351_v22 = vsub.f32 %v340_v16, %v347_v21 }
 0x19c   : > { %v353_v23 = vmul.f32 1.442695, %v351_v22 }
 0x19e   : > { %558 = vpow2.f32 %v353_v23 }
 0x1a1   : > { %v350_v24 = vpop.xlane.xlu0 %349 }
 0x1a2   : > { %v352_v25 = vsub.f32 %v342_v19, %v350_v24 }
 0x1a4   : > { %v559_v26 = vpop.eup %558  ;;  %v355_v27 = vmul.f32 1.442695, %v352_v25 }
 0x1a5   : > { %v357_v28 = vsel %vm344_vm2, %v559_v26, 0.0 }
 0x1a6   : > { %560 = vpow2.f32 %v355_v27  ;;  %358 = vadd.xlane.f32.xlu1 %v357_v28 }
 0x1ac   : > { %v561_v29 = vpop.eup %560 }
 0x1ad   : > { %v360_v30 = vsel %vm344_vm2, %v561_v29, 0.0 }
 0x1ae   : > { %361 = vadd.xlane.f32.xlu1 %v360_v30 }
 0x1af   : > { %593 = shalt.err (!%p590_p3)
}
 0x1b0   : > { %s630_s20 = smov 128   ;;  %s631_s16 = smov 8  }
 0x1b1   : > { %515 = dma.vmem_to_hbm [thread:$0]  (%p705_p5), %s394_s14, 256, %s396_s19, %s377_s26, %s630_s20, %s630_s20, %s631_s16  }
 0x1b2   : > { %s264_s28 = scalar_lea.vmem %s796_s5, %s489_s12 }
 0x219   : > { %v359_v31 = vpop.xlane.xlu1 %358 }
 0x21a   : > { %562 = vlog2.f32 %v359_v31 }
 0x220   : > { %v563_v32 = vpop.eup %562 }
 0x221   : > { %v364_v33 = vmul.f32 0.6931472, %v563_v32  ;;  %v362_v34 = vpop.xlane.xlu1 %361 }
 0x222   : > { %564 = vlog2.f32 %v362_v34 }
 0x223   : > { %v367_v35 = vsub.f32 %v351_v22, %v364_v33 }
 0x225   : > { %369 = vst.msk [vmem:[%s264_s28] sm:$0xff] %vm344_vm2, %v367_v35 }
 0x228   : > { %v565_v36 = vpop.eup %564 }
 0x229   : > { %v366_v37 = vmul.f32 0.6931472, %v565_v36 }
 0x22b   : > { %v368_v38 = vsub.f32 %v352_v25, %v366_v37 }
 0x22d   : > { %370 = vst.msk [vmem:[%s264_s28 + $0x8] sm:$0xff] %vm344_vm2, %v368_v38 }
 0x22e PF: > { %p521_p4 = scmp.ge.s32.totalorder %s628_s24, 2  ;;  %s418_s7 = sand.u32 1, %s616_s21  }
 0x22f   : > { %s419_s11 = scalar_lea.sflag [#allocation3], %s418_s7 }
 0x230   : > { %p518_p5 = pnand %p521_p4, %p709_p6 }
 0x232   : > { %p519_p7 = pneg %p518_p5 }
 0x234   : > { %611 = dma.done.wait (%p519_p7), %s419_s11, 256  }
 0x235   : > { %613 = vsyncadd (%p519_p7), %s419_s11, 4294967040  ;;  %p17_p8 = scmp.ge.s32.totalorder %s692_s27, 4   ;;  %s800_s21 = smov %s620_s22 }
 0x236   : > { %s801_s22 = smov %s624_s23  ;;  %s802_s23 = smov %s703_s30 }
 0x237   : > { %s803_s24 = smov %s692_s27  ;;  %19 = sbr.rel (!%p17_p8) target bundleno = 3 (0x3), region = 87 }
 0x23c   :  { %425 = vsyncpa [#allocation3], 1 }
 0x23d   :  { %427 = vsyncpa [#allocation3 + $0x1], 1 }

// kernel: tpu_custom_call.1
= control target key start
LH: loop header
LB: loop body
LE: loop exit
PB: predicated region body
PF: predicated region fallthrough
CT: control target
= control target key end

     0   :  { %12 = vsyncpa [#allocation3], 0  ;;  %s791_s0 = inlined_call_operand.vmem [shape: f32[32,16], index: 0, kind: input, shape index: {}]   ;;  %s792_s1 = inlined_call_operand.vmem [shape: bf16[16,32], index: 1, kind: input, shape index: {}]   ;;  %s793_s2 = inlined_call_operand.vmem [shape: f32[1,32], index: 2, kind: input, shape index: {}]   ;;  %s794_s3 = inlined_call_operand.vmem [shape: bf16[32,7], index: 3, kind: input, shape index: {}]   ;;  %s795_s4 = inlined_call_operand.vmem [shape: f32[1,7], index: 4, kind: input, shape index: {}]   ;;  %s796_s5 = inlined_call_operand.vmem [shape: f32[32,7], index: 5, kind: output, shape index: {0}]   ;;  %s797_s6 = inlined_call_operand.hbm [shape: f32[32,32], index: 6, kind: output, shape index: {1}]  }
   0x1   :  { %14 = vsyncpa [#allocation3 + $0x1], 0  ;;  %s667_s21 = smov 0   ;;  %s669_s22 = smov 0  }
   0x2   :  { %s671_s23 = smov 0   ;;  %s673_s24 = smov 0  }
   0x3 LB: > { %s688_s25 = sadd.s32 4294967295, %s628_s24   ;;  %s483_s26 = sadd.s32 4294967294, %s628_s24   ;;  %s628_s24 = sphi %s673_s24, %s803_s24   ;;  %s624_s23 = sphi %s671_s23, %s802_s23   ;;  %s620_s22 = sphi %s669_s22, %s801_s22   ;;  %s616_s21 = sphi %s667_s21, %s800_s21  }
   0x4   : > { %s692_s27 = sadd.s32 1, %s628_s24   ;;  %s163_s28 = sadd.s32 1, %s624_s23 }
   0x5   : > { %s160_s29 = ssub.s32 %s628_s24, %s692_s27  ;;  %p173_p0 = scmp.ne.s32.totalorder %s624_s23, %s620_s22 }
   0x6   : > { %p161_p1 = scmp.eq.s32.totalorder %s160_s29, 0  ;;  %p174_p2 = scmp.eq.s32.totalorder %s688_s25, 1 }
   0x7   : > { %p179_p3 = scmp.ne.s32.totalorder %s620_s22, %s616_s21  ;;  %p180_p4 = scmp.eq.s32.totalorder %s483_s26, 1 }
   0x8   : > { %s703_s30 = scalar_select %p161_p1, %s624_s23, %s163_s28  }
   0x9   : > { %p705_p5 = por %p174_p2, %p173_p0  ;;  %p709_p6 = por %p180_p4, %p179_p3 }
   0xa   : > { %p486_p7 = scmp.ge.s32.totalorder %s628_s24, 1  ;;  %p219_p8 = scmp.lt.s32.totalorder %s628_s24, 3 }
   0xc   : > { %p220_p9 = pnand %p486_p7, %p219_p8 }
   0xd   : > { %s488_s11 = sshll.u32 (!%p220_p9), %s688_s25, 1  ;;  %s251_s20 = sand.u32 (!%p220_p9), 1, %s620_s22  }
   0xe   : > { %223 = sbr.rel (%p220_p9) target bundleno = 558 (0x22e), region = 40  ;;  %p255_p10 = scmp.lt.s32.totalorder (!%p220_p9), %s488_s11, 3 }
   0xf   : > { %s487_s29 = sshll.u32 (!%p220_p9), %s251_s20, 4  ;;  %s377_s26 = scalar_lea.sflag (!%p220_p9), [#allocation3], %s251_s20 }
  0x10   : > { %s739_s9 = scalar_lea.vmem (!%p220_p9), [#allocation2], %s487_s29  ;;  %s586_s10 = scalar_lea.hbm (!%p220_p9), %s797_s6, 32 }
  0x11   : > { %s393_s14 = sshll.u32 (!%p220_p9), %s739_s9, 4  ;;  %s394_s14 = int_to_ptr.vmem [resolvable:$true] %s393_s14 }
  0x13   : > { %v511_v0 = vld [vmem:[%s792_s1] sm:$0xff]  ;;  %s805_s11 = smov (!%p255_p10, %s488_s11), 3  ;;  %vm283_vm0 = vcmask 130048   ;;  %v513_v4 = vld [vmem:[%s794_s3 + $0x8] sm:$0xff]  ;;  %vm301_vm1 = vcmask 261120   ;;  %vm344_vm2 = vcmask 56320  }
  0x14   : > { %294 = vmatpush.bf16.msra.mxu0 %v511_v0  ;;  %s489_s12 = sshll.u32 %s805_s11, 3  ;;  %336 = vmatpush.bf16.msra.mxu1 %v513_v4  ;;  %v512_v5 = vld [vmem:[%s794_s3] sm:$0xff] }
  0x15   : > { %s258_s15 = scalar_lea.vmem %s791_s0, %s489_s12  ;;  %v556_v6 = vld [vmem:[%s793_s2] ss:$0 sm:$0xff] }
  0x16   : > { %v268_v1 = vld [vmem:[%s258_s15] sm:$0xff]  ;;  %v269_v2 = vld [vmem:[%s258_s15 + $0x8] sm:$0xff]  ;;  %s514_s15 = sshll.u32 %s688_s25, 4 }
  0x17   : > { %v270_v3 = vpack.c.bf16 %v269_v2, %v268_v1  ;;  %v557_v14 = vld [vmem:[%s795_s4] ss:$0 sm:$0xff]  ;;  %s392_s18 = scalar_lea.hbm %s797_s6, %s514_s15 }
  0x18   : > { %337 = vmatpush.bf16.msra.mxu1 %v512_v5  ;;  %s395_s19 = sshll.u32 %s392_s18, 4  ;;  %s396_s19 = int_to_ptr.hbm [resolvable:$true] %s395_s19 }
  0x19   : > { %496 = vmatmul.msk.bf16.vlgmr.msra.gmra.mxu0 %vm283_vm0, %v270_v3  ;;  %s580_s28 = sshra.s32 %s396_s19, 4  ;;  %s581_s28 = int_to_ptr.hbm [resolvable:$true] %s580_s28 }
  0x1a   : > { %s582_s29 = scalar_lea.hbm %s581_s28, 16  ;;  %p587_p0 = scmp.lt.s32.totalorder %s581_s28, %s797_s6 }
  0x1b   : > { %p583_p11 = scmp.ne.s32.totalorder %s581_s28, %s582_s29  ;;  %p588_p1 = scmp.lt.s32.totalorder %s586_s10, %s582_s29 }
  0x1d   : > { %p584_p12 = pnand %p583_p11, %p705_p5  ;;  %p589_p2 = por %p588_p1, %p587_p0 }
  0x1f   : > { %p585_p13 = pneg %p584_p12 }
  0x21   : > { %p590_p3 = pnand %p589_p2, %p585_p13 }
  0x96   : > { %v296_v7 = vpop.f32.mrf.mxu0 }
  0x97   : > { %v297_v8 = vadd.f32 %v556_v6, %v296_v7 }
  0x99   : > { %302 = vst.msk [vmem:[%s739_s9] sm:$0xff] %vm301_vm1, %v297_v8  ;;  %v304_v11 = vmax.f32 %v297_v8, 0.0 }
  0x9e   : > { %v298_v9 = vpop.f32.mrf.mxu0 }
  0x9f   : > { %v299_v10 = vadd.f32 %v556_v6, %v298_v9 }
  0xa1   : > { %v305_v12 = vmax.f32 %v299_v10, 0.0  ;;  %303 = vst.msk [vmem:[%s739_s9 + $0x8] sm:$0xff] %vm301_vm1, %v299_v10 }
  0xa3   : > { %v306_v13 = vpack.c.bf16 %v305_v12, %v304_v11 }
  0xa5   : > { %505 = vmatmul.msk.bf16.vlgmr.msra.gmra.mxu1 %vm301_vm1, %v306_v13 }
 0x122   : > { %v339_v15 = vpop.f32.mrf.mxu1 }
 0x123   : > { %v340_v16 = vadd.f32 %v557_v14, %v339_v15 }
 0x125   : > { %v345_v17 = vsel %vm344_vm2, %v340_v16, -inf }
 0x126   : > { %346 = vmax.xlane.f32.xlu0 %v345_v17 }
 0x12a   : > { %v341_v18 = vpop.f32.mrf.mxu1 }
 0x12b   : > { %v342_v19 = vadd.f32 %v557_v14, %v341_v18 }
 0x12d   : > { %v348_v20 = vsel %vm344_vm2, %v342_v19, -inf }
 0x12e   : > { %349 = vmax.xlane.f32.xlu0 %v348_v20 }
 0x199   : > { %v347_v21 = vpop.xlane.xlu0 %346 }
 0x19a   : > { %v351_v22 = vsub.f32 %v340_v16, %v347_v21 }
 0x19c   : > { %v353_v23 = vmul.f32 1.442695, %v351_v22 }
 0x19e   : > { %558 = vpow2.f32 %v353_v23 }
 0x1a1   : > { %v350_v24 = vpop.xlane.xlu0 %349 }
 0x1a2   : > { %v352_v25 = vsub.f32 %v342_v19, %v350_v24 }
 0x1a4   : > { %v559_v26 = vpop.eup %558  ;;  %v355_v27 = vmul.f32 1.442695, %v352_v25 }
 0x1a5   : > { %v357_v28 = vsel %vm344_vm2, %v559_v26, 0.0 }
 0x1a6   : > { %560 = vpow2.f32 %v355_v27  ;;  %358 = vadd.xlane.f32.xlu1 %v357_v28 }
 0x1ac   : > { %v561_v29 = vpop.eup %560 }
 0x1ad   : > { %v360_v30 = vsel %vm344_vm2, %v561_v29, 0.0 }
 0x1ae   : > { %361 = vadd.xlane.f32.xlu1 %v360_v30 }
 0x1af   : > { %593 = shalt.err (!%p590_p3)
}
 0x1b0   : > { %s630_s20 = smov 128   ;;  %s631_s16 = smov 8  }
 0x1b1   : > { %515 = dma.vmem_to_hbm [thread:$0]  (%p705_p5), %s394_s14, 256, %s396_s19, %s377_s26, %s630_s20, %s630_s20, %s631_s16  }
 0x1b2   : > { %s264_s28 = scalar_lea.vmem %s796_s5, %s489_s12 }
 0x219   : > { %v359_v31 = vpop.xlane.xlu1 %358 }
 0x21a   : > { %562 = vlog2.f32 %v359_v31 }
 0x220   : > { %v563_v32 = vpop.eup %562 }
 0x221   : > { %v364_v33 = vmul.f32 0.6931472, %v563_v32  ;;  %v362_v34 = vpop.xlane.xlu1 %361 }
 0x222   : > { %564 = vlog2.f32 %v362_v34 }
 0x223   : > { %v367_v35 = vsub.f32 %v351_v22, %v364_v33 }
 0x225   : > { %369 = vst.msk [vmem:[%s264_s28] sm:$0xff] %vm344_vm2, %v367_v35 }
 0x228   : > { %v565_v36 = vpop.eup %564 }
 0x229   : > { %v366_v37 = vmul.f32 0.6931472, %v565_v36 }
 0x22b   : > { %v368_v38 = vsub.f32 %v352_v25, %v366_v37 }
 0x22d   : > { %370 = vst.msk [vmem:[%s264_s28 + $0x8] sm:$0xff] %vm344_vm2, %v368_v38 }
 0x22e PF: > { %p521_p4 = scmp.ge.s32.totalorder %s628_s24, 2  ;;  %s418_s7 = sand.u32 1, %s616_s21  }
 0x22f   : > { %s419_s11 = scalar_lea.sflag [#allocation3], %s418_s7 }
 0x230   : > { %p518_p5 = pnand %p521_p4, %p709_p6 }
 0x232   : > { %p519_p7 = pneg %p518_p5 }
 0x234   : > { %611 = dma.done.wait (%p519_p7), %s419_s11, 256  }
 0x235   : > { %613 = vsyncadd (%p519_p7), %s419_s11, 4294967040  ;;  %p17_p8 = scmp.ge.s32.totalorder %s692_s27, 4   ;;  %s800_s21 = smov %s620_s22 }
 0x236   : > { %s801_s22 = smov %s624_s23  ;;  %s802_s23 = smov %s703_s30 }
 0x237   : > { %s803_s24 = smov %s692_s27  ;;  %19 = sbr.rel (!%p17_p8) target bundleno = 3 (0x3), region = 87 }
 0x23c   :  { %425 = vsyncpa [#allocation3], 1 }
 0x23d   :  { %427 = vsyncpa [#allocation3 + $0x1], 1 }

</bundles_post_ra>
